<compile_context>
chip_gen: v7x
topology: tpu7x:2x2x1
jax: 0.10.0
libtpu: 0.0.40
codegen_flags: <defaults>
</compile_context>

<pallas_src>
import jax
import jax.numpy as jnp
from jax import lax
from jax.experimental import pallas as pl
from jax.experimental.pallas import tpu as pltpu


def dqn_kernel(x_ref, w1_ref, b1_ref, w2_ref, b2_ref, w3t_ref, b3_ref, out_ref):
    # x_ref:  [tb, in_dim] f32  (batch-major, exactly as the caller stores it)
    # w1_ref: [fc1, in_dim] bf16, w2_ref: [fc2, fc1] bf16 (PyTorch layout)
    # w3t_ref:[fc2, n_act] bf16  (pre-transposed so the output is batch-major)
    # b1/b2:  [out, 1] f32,  b3: [1, n_act] f32
    x = x_ref[...].astype(jnp.bfloat16)

    # Layer 1: contract the shared `in` axis (trans_b folded into the MXU feed).
    # Result is feature-major [fc1, tb] -> batch sits on the 128-lane axis for
    # the bias-add / ReLU.
    h1 = lax.dot_general(w1_ref[...], x,
                         dimension_numbers=(((1,), (1,)), ((), ())),
                         preferred_element_type=jnp.float32)
    h1 = jnp.maximum(h1 + b1_ref[...], 0.0).astype(jnp.bfloat16)

    # Layer 2: plain [fc2, fc1] @ [fc1, tb] -> [fc2, tb].
    h2 = jnp.dot(w2_ref[...], h1, preferred_element_type=jnp.float32)
    h2 = jnp.maximum(h2 + b2_ref[...], 0.0).astype(jnp.bfloat16)

    # Layer 3: contract fc2 (h2 is feature-major, so its contraction axis is
    # dim 0) against the pre-transposed weights -> batch-major [tb, n_act].
    out = lax.dot_general(h2, w3t_ref[...],
                          dimension_numbers=(((0,), (0,)), ((), ())),
                          preferred_element_type=jnp.float32)
    out_ref[...] = out + b3_ref[...]


def _round_up(x, m):
    return ((x + m - 1) // m) * m


def _num_tensorcores():
    """2 TensorCores per chip on v7x, 1 on v5e/v6e. Best-effort detection."""
    try:
        kind = jax.devices()[0].device_kind.lower()
        return 2 if ("v7" in kind or "7x" in kind) else 1
    except Exception:  # pragma: no cover - conservative fallback
        return 1


def _choose_batch_tile(B):
    Bp = _round_up(B, 128)  # lane-aligned tile candidates
    if _num_tensorcores() >= 2 and Bp >= 256:
        # Keep >=2 grid steps so the "parallel" batch axis shards across both
        # TensorCores; cap at 256 to keep h1/h2 vreg pressure low.
        tb = max(128, min(256, _round_up(Bp // 2, 128)))
    else:
        # Single TensorCore: one grid step avoids ~0.35us/step grid overhead.
        tb = min(256, Bp)
    return tb


def deep_q_forward(state, params, *, tb=None):
    """state: [B, input_dim] f32. params: PyTorch-layout w1,b1,w2,b2,w3,b3.

    Returns [B, n_actions] f32 Q-values (same semantics as the nn.Module).
    """
    B, in_dim = state.shape
    fc1 = params["w1"].shape[0]
    fc2 = params["w2"].shape[0]
    n_act = params["w3"].shape[0]

    if tb is None:
        tb = _choose_batch_tile(B)
    grid = (pl.cdiv(B, tb),)

    # Weights: bf16 once (MXU-native on v6e/v7x); biases stay f32 for the VPU.
    w1 = params["w1"].astype(jnp.bfloat16)
    w2 = params["w2"].astype(jnp.bfloat16)
    w3t = params["w3"].astype(jnp.bfloat16).T          # [fc2, n_act], tiny
    b1 = params["b1"].astype(jnp.float32).reshape(fc1, 1)
    b2 = params["b2"].astype(jnp.float32).reshape(fc2, 1)
    b3 = params["b3"].astype(jnp.float32).reshape(1, n_act)

    flops = 2 * B * (in_dim * fc1 + fc1 * fc2 + fc2 * n_act)
    bytes_accessed = (state.size * 4
                      + (w1.size + w2.size + w3t.size) * 2
                      + (b1.size + b2.size + b3.size) * 4
                      + B * n_act * 4)

    out = pl.pallas_call(
        dqn_kernel,
        out_shape=jax.ShapeDtypeStruct((B, n_act), jnp.float32),
        grid_spec=pltpu.PrefetchScalarGridSpec(
            num_scalar_prefetch=0,
            grid=grid,
            in_specs=[
                # streamed per batch tile (last tile may be partial -> Pallas
                # pads reads / masks writes; batch rows are independent)
                pl.BlockSpec((tb, in_dim), lambda i: (i, 0)),
                # weights / biases: full blocks, resident across all tiles
                pl.BlockSpec((fc1, in_dim), lambda i: (0, 0)),
                pl.BlockSpec((fc1, 1), lambda i: (0, 0)),
                pl.BlockSpec((fc2, fc1), lambda i: (0, 0)),
                pl.BlockSpec((fc2, 1), lambda i: (0, 0)),
                pl.BlockSpec((fc2, n_act), lambda i: (0, 0)),
                pl.BlockSpec((1, n_act), lambda i: (0, 0)),
            ],
            out_specs=pl.BlockSpec((tb, n_act), lambda i: (i, 0)),
        ),
        compiler_params=pltpu.CompilerParams(
            dimension_semantics=("parallel",),
        ),
        cost_estimate=pl.CostEstimate(flops=flops, transcendentals=0,
                                      bytes_accessed=bytes_accessed),
    )(state, w1, b1, w2, b2, w3t, b3)

    return out


def init_params(key, input_dim, fc1_dims, fc2_dims, n_actions):
    """PyTorch nn.Linear default init: U(-1/sqrt(fan_in), +1/sqrt(fan_in)).
    Weights in PyTorch layout [out, in]; biases as [out]."""
    ks = jax.random.split(key, 6)

    def linear(kw, kb, fan_in, fan_out):
        bound = 1.0 / jnp.sqrt(jnp.float32(fan_in))
        w = jax.random.uniform(kw, (fan_out, fan_in), jnp.float32, -bound, bound)
        b = jax.random.uniform(kb, (fan_out,), jnp.float32, -bound, bound)
        return w, b

    w1, b1 = linear(ks[0], ks[1], input_dim, fc1_dims)
    w2, b2 = linear(ks[2], ks[3], fc1_dims, fc2_dims)
    w3, b3 = linear(ks[4], ks[5], fc2_dims, n_actions)
    return {"w1": w1, "b1": b1, "w2": w2, "b2": b2, "w3": w3, "b3": b3}

# TODO(synk): Adam optimizer / MSELoss / .to(device) from the PyTorch module are
# training utilities, not part of forward(); not implemented as kernels.


def _reference(state, params):
    """Pure-JAX reference with the same bf16-input / f32-accumulate math."""
    xb = state.astype(jnp.bfloat16)
    w1b = params["w1"].astype(jnp.bfloat16)
    w2b = params["w2"].astype(jnp.bfloat16)
    w3b = params["w3"].astype(jnp.bfloat16)
    h1 = jnp.maximum(
        jnp.dot(xb, w1b.T, preferred_element_type=jnp.float32)
        + params["b1"][None, :], 0.0).astype(jnp.bfloat16)
    h2 = jnp.maximum(
        jnp.dot(h1, w2b.T, preferred_element_type=jnp.float32)
        + params["b2"][None, :], 0.0).astype(jnp.bfloat16)
    return (jnp.dot(h2, w3b.T, preferred_element_type=jnp.float32)
            + params["b3"][None, :])


if __name__ == "__main__":
    # Shapes implied by the module: input_dims=(16,), fc1=64, fc2=64, n_actions=8.
    input_dim, fc1_dims, fc2_dims, n_actions = 16, 64, 64, 8

    key = jax.random.PRNGKey(0)
    k_state, k_params, k_small = jax.random.split(key, 3)
    params = init_params(k_params, input_dim, fc1_dims, fc2_dims, n_actions)

    # Replay-batch-sized call (multiple of the lane tile).
    state = jax.random.normal(k_state, (256, input_dim), jnp.float32)
    actions = deep_q_forward(state, params)
    jax.block_until_ready(actions)
    assert actions.shape == (256, n_actions)
    ref = _reference(state, params)
    assert jnp.allclose(actions, ref, atol=1e-2, rtol=1e-2), (
        float(jnp.max(jnp.abs(actions - ref))))

    # Ragged batch: exercises the partial-tile (padded read / masked write) path.
    state_s = jax.random.normal(k_small, (37, input_dim), jnp.float32)
    actions_s = deep_q_forward(state_s, params)
    jax.block_until_ready(actions_s)
    assert actions_s.shape == (37, n_actions)
    ref_s = _reference(state_s, params)
    assert jnp.allclose(actions_s, ref_s, atol=1e-2, rtol=1e-2), (
        float(jnp.max(jnp.abs(actions_s - ref_s))))

    print("KERNEL_OK")
</pallas_src>

<mosaic_0001>
module attributes {stable_mosaic.version = 11 : i64} {
  func.func @dqn_kernel(%arg0: i32, %arg1: memref<256x16xf32, #tpu.memory_space<vmem>>, %arg2: memref<64x16xbf16, #tpu.memory_space<vmem>>, %arg3: memref<64x1xf32, #tpu.memory_space<vmem>>, %arg4: memref<64x64xbf16, #tpu.memory_space<vmem>>, %arg5: memref<64x1xf32, #tpu.memory_space<vmem>>, %arg6: memref<64x8xbf16, #tpu.memory_space<vmem>>, %arg7: memref<1x8xf32, #tpu.memory_space<vmem>>, %arg8: memref<256x8xf32, #tpu.memory_space<vmem>>) attributes {dimension_semantics = [#tpu.dimension_semantics<parallel>], iteration_bounds = array<i64: 1>, scalar_prefetch = 0 : i64, scratch_operands = 0 : i64, tpu.core_type = #tpu.core_type<tc>, window_params = [{transform_indices = @transform_0, window_bounds = array<i64: 256, 16>}, {pipeline_mode = #tpu.pipeline_mode<synchronous>, transform_indices = @transform_1, window_bounds = array<i64: 64, 16>}, {pipeline_mode = #tpu.pipeline_mode<synchronous>, transform_indices = @transform_2, window_bounds = array<i64: 64, 1>}, {pipeline_mode = #tpu.pipeline_mode<synchronous>, transform_indices = @transform_3, window_bounds = array<i64: 64, 64>}, {pipeline_mode = #tpu.pipeline_mode<synchronous>, transform_indices = @transform_4, window_bounds = array<i64: 64, 1>}, {pipeline_mode = #tpu.pipeline_mode<synchronous>, transform_indices = @transform_5, window_bounds = array<i64: 64, 8>}, {pipeline_mode = #tpu.pipeline_mode<synchronous>, transform_indices = @transform_6, window_bounds = array<i64: 1, 8>}, {transform_indices = @transform_7, window_bounds = array<i64: 256, 8>}]} {
    %c0 = arith.constant 0 : index
    %c0_0 = arith.constant 0 : index
    %0 = vector.load %arg1[%c0, %c0_0] : memref<256x16xf32, #tpu.memory_space<vmem>>, vector<256x16xf32>
    %1 = arith.truncf %0 : vector<256x16xf32> to vector<256x16xbf16>
    %c0_1 = arith.constant 0 : index
    %c0_2 = arith.constant 0 : index
    %2 = vector.load %arg2[%c0_1, %c0_2] : memref<64x16xbf16, #tpu.memory_space<vmem>>, vector<64x16xbf16>
    %cst = arith.constant dense<0.000000e+00> : vector<64x256xf32>
    %3 = tpu.matmul %2, %1, %cst {dimension_numbers = #tpu.dot_dimension_numbers<[1], [1], [0], [0], [0, 0, 1, 0], [], []>} : vector<64x16xbf16>, vector<256x16xbf16>, vector<64x256xf32> -> vector<64x256xf32>
    %c0_3 = arith.constant 0 : index
    %c0_4 = arith.constant 0 : index
    %4 = vector.load %arg3[%c0_3, %c0_4] : memref<64x1xf32, #tpu.memory_space<vmem>>, vector<64x1xf32>
    %5 = vector.broadcast %4 : vector<64x1xf32> to vector<64x256xf32>
    %6 = arith.addf %3, %5 : vector<64x256xf32>
    %cst_5 = arith.constant 0.000000e+00 : f32
    %7 = vector.broadcast %cst_5 : f32 to vector<64x256xf32>
    %8 = arith.maximumf %6, %7 : vector<64x256xf32>
    %9 = arith.truncf %8 : vector<64x256xf32> to vector<64x256xbf16>
    %c0_6 = arith.constant 0 : index
    %c0_7 = arith.constant 0 : index
    %10 = vector.load %arg4[%c0_6, %c0_7] : memref<64x64xbf16, #tpu.memory_space<vmem>>, vector<64x64xbf16>
    %cst_8 = arith.constant dense<0.000000e+00> : vector<64x256xf32>
    %11 = tpu.matmul %10, %9, %cst_8 {dimension_numbers = #tpu.dot_dimension_numbers<[1], [0], [0], [1], [0, 0, 1, 1], [], []>} : vector<64x64xbf16>, vector<64x256xbf16>, vector<64x256xf32> -> vector<64x256xf32>
    %c0_9 = arith.constant 0 : index
    %c0_10 = arith.constant 0 : index
    %12 = vector.load %arg5[%c0_9, %c0_10] : memref<64x1xf32, #tpu.memory_space<vmem>>, vector<64x1xf32>
    %13 = vector.broadcast %12 : vector<64x1xf32> to vector<64x256xf32>
    %14 = arith.addf %11, %13 : vector<64x256xf32>
    %cst_11 = arith.constant 0.000000e+00 : f32
    %15 = vector.broadcast %cst_11 : f32 to vector<64x256xf32>
    %16 = arith.maximumf %14, %15 : vector<64x256xf32>
    %17 = arith.truncf %16 : vector<64x256xf32> to vector<64x256xbf16>
    %c0_12 = arith.constant 0 : index
    %c0_13 = arith.constant 0 : index
    %18 = vector.load %arg6[%c0_12, %c0_13] : memref<64x8xbf16, #tpu.memory_space<vmem>>, vector<64x8xbf16>
    %cst_14 = arith.constant dense<0.000000e+00> : vector<256x8xf32>
    %19 = tpu.matmul %17, %18, %cst_14 {dimension_numbers = #tpu.dot_dimension_numbers<[0], [0], [1], [1], [0, 1, 1, 1], [], []>} : vector<64x256xbf16>, vector<64x8xbf16>, vector<256x8xf32> -> vector<256x8xf32>
    %c0_15 = arith.constant 0 : index
    %c0_16 = arith.constant 0 : index
    %20 = vector.load %arg7[%c0_15, %c0_16] : memref<1x8xf32, #tpu.memory_space<vmem>>, vector<1x8xf32>
    %21 = vector.broadcast %20 : vector<1x8xf32> to vector<256x8xf32>
    %22 = arith.addf %19, %21 : vector<256x8xf32>
    %c0_17 = arith.constant 0 : index
    %c0_18 = arith.constant 0 : index
    %23 = vector.load %arg8[%c0_17, %c0_18] : memref<256x8xf32, #tpu.memory_space<vmem>>, vector<256x8xf32>
    tpu.vector_store %arg8[%c0_17, %c0_18], %22 {strides = array<i32>} : memref<256x8xf32, #tpu.memory_space<vmem>>, vector<256x8xf32>,
    return
  }
  func.func @transform_0(%arg0: i32) -> (i32, i32) {
    %c0_i32 = arith.constant 0 : i32
    %c0_i32_0 = arith.constant 0 : i32
    return %arg0, %c0_i32 : i32, i32
  }
  func.func @transform_1(%arg0: i32) -> (i32, i32) {
    %c0_i32 = arith.constant 0 : i32
    %c0_i32_0 = arith.constant 0 : i32
    %c0_i32_1 = arith.constant 0 : i32
    return %c0_i32, %c0_i32_0 : i32, i32
  }
  func.func @transform_2(%arg0: i32) -> (i32, i32) {
    %c0_i32 = arith.constant 0 : i32
    %c0_i32_0 = arith.constant 0 : i32
    %c0_i32_1 = arith.constant 0 : i32
    return %c0_i32, %c0_i32_0 : i32, i32
  }
  func.func @transform_3(%arg0: i32) -> (i32, i32) {
    %c0_i32 = arith.constant 0 : i32
    %c0_i32_0 = arith.constant 0 : i32
    %c0_i32_1 = arith.constant 0 : i32
    return %c0_i32, %c0_i32_0 : i32, i32
  }
  func.func @transform_4(%arg0: i32) -> (i32, i32) {
    %c0_i32 = arith.constant 0 : i32
    %c0_i32_0 = arith.constant 0 : i32
    %c0_i32_1 = arith.constant 0 : i32
    return %c0_i32, %c0_i32_0 : i32, i32
  }
  func.func @transform_5(%arg0: i32) -> (i32, i32) {
    %c0_i32 = arith.constant 0 : i32
    %c0_i32_0 = arith.constant 0 : i32
    %c0_i32_1 = arith.constant 0 : i32
    return %c0_i32, %c0_i32_0 : i32, i32
  }
  func.func @transform_6(%arg0: i32) -> (i32, i32) {
    %c0_i32 = arith.constant 0 : i32
    %c0_i32_0 = arith.constant 0 : i32
    %c0_i32_1 = arith.constant 0 : i32
    return %c0_i32, %c0_i32_0 : i32, i32
  }
  func.func @transform_7(%arg0: i32) -> (i32, i32) {
    %c0_i32 = arith.constant 0 : i32
    %c0_i32_0 = arith.constant 0 : i32
    return %arg0, %c0_i32 : i32, i32
  }
}

</mosaic_0001>

<bundles_post_ra>
// kernel: tpu_custom_call.1
= control target key start
LH: loop header
LB: loop body
LE: loop exit
PB: predicated region body
PF: predicated region fallthrough
CT: control target
= control target key end

     0   :  { %vm151_vm0 = vcmask 130048   ;;  %v964_v3 = vmov 0   ;;  %vm385_vm1 = vcmask 523264   ;;  %vm775_vm2 = vcmask 64512   ;;  %s1404_s0 = inlined_call_operand.vmem [shape: f32[256,16], index: 0, kind: input, shape index: {}]   ;;  %s1405_s1 = inlined_call_operand.vmem [shape: bf16[64,16], index: 1, kind: input, shape index: {}]   ;;  %s1406_s2 = inlined_call_operand.vmem [shape: f32[64,1], index: 2, kind: input, shape index: {}]   ;;  %s1407_s4 = inlined_call_operand.vmem [shape: f32[64,1], index: 4, kind: input, shape index: {}]   ;;  %s1408_s3 = inlined_call_operand.vmem [shape: bf16[64,64], index: 3, kind: input, shape index: {}]   ;;  %s1409_s5 = inlined_call_operand.vmem [shape: bf16[64,8], index: 5, kind: input, shape index: {}]   ;;  %s1410_s6 = inlined_call_operand.vmem [shape: f32[1,8], index: 6, kind: input, shape index: {}]   ;;  %s1411_s7 = inlined_call_operand.vmem [shape: f32[256,8], index: 7, kind: output, shape index: {}]  }
   0x1   :  { %v43_v0 = vld [vmem:[%s1404_s0 + $0x80] sm:$0xff]  ;;  %v44_v1 = vld [vmem:[%s1404_s0 + $0x88] sm:$0xff]  ;;  %950 = vset.pattern.permute.xlu0 %v964_v3  ;;  %951 = vset.pattern.permute.xlu1 %v964_v3  ;;  %v45_v6 = vld [vmem:[%s1404_s0 + $0x90] sm:$0xff] }
   0x2   :  { %v27_v2 = vld [vmem:[%s1404_s0] sm:$0xff]  ;;  %v67_v4 = vpack.c.bf16 %v44_v1, %v43_v0  ;;  %v28_v5 = vld [vmem:[%s1404_s0 + $0x8] sm:$0xff]  ;;  %v46_v7 = vld [vmem:[%s1404_s0 + $0x98] sm:$0xff]  ;;  %440 = vmatprep.mubr.bf16.mxu1 %v964_v3 }
   0x3   :  { %v59_v8 = vpack.c.bf16 %v28_v5, %v27_v2  ;;  %v68_v9 = vpack.c.bf16 %v46_v7, %v45_v6  ;;  %v29_v10 = vld [vmem:[%s1404_s0 + $0x10] sm:$0xff]  ;;  %v30_v11 = vld [vmem:[%s1404_s0 + $0x18] sm:$0xff]  ;;  %v47_v14 = vld [vmem:[%s1404_s0 + $0xa0] sm:$0xff] }
   0x4   :  { %941 = vmatprep.subr.msk.bf16.mxu0 %vm151_vm0, %v67_v4  ;;  %v60_v13 = vpack.c.bf16 %v30_v11, %v29_v10  ;;  %v48_v15 = vld [vmem:[%s1404_s0 + $0xa8] sm:$0xff]  ;;  %v31_v18 = vld [vmem:[%s1404_s0 + $0x20] sm:$0xff]  ;;  %v49_v23 = vld [vmem:[%s1404_s0 + $0xb0] sm:$0xff] }
   0x5   :  { %v165_v12 = vsel %vm151_vm0, %v59_v8, 0  ;;  %v69_v17 = vpack.c.bf16 %v48_v15, %v47_v14  ;;  %v32_v19 = vld [vmem:[%s1404_s0 + $0x28] sm:$0xff]  ;;  %v1051_v20 = vld [vmem:[%s1405_s1] sm:$0xff]   ;;  %v50_v24 = vld [vmem:[%s1404_s0 + $0xb8] sm:$0xff] }
   0x6   :  { %850 = vmatpush3.bf16.xpose.msra.mxu0 %v165_v12  ;;  %v168_v16 = vsel %vm151_vm0, %v60_v13, 0  ;;  %865 = vmatprep.mubr.msk.bf16.mxu0 %vm151_vm0, %v1051_v20  ;;  %v61_v21 = vpack.c.bf16 %v32_v19, %v31_v18  ;;  %v83_v22 = vld [vmem:[%s1406_s2] sm:$0xff]  ;;  %v85_v25 = vld [vmem:[%s1406_s2 + $0x10] sm:$0xff]  ;;  %v84_v26 = vld [vmem:[%s1406_s2 + $0x8] sm:$0xff]  ;;  %v70_v29 = vpack.c.bf16 %v50_v24, %v49_v23 }
   0x7   :  { %942 = vmatprep.subr.msk.bf16.mxu0 %vm151_vm0, %v68_v9  ;;  %93 = vperm.xlu0 %950, %v83_v22   ;;  %v86_v27 = vld [vmem:[%s1406_s2 + $0x18] sm:$0xff]  ;;  %v33_v30 = vld [vmem:[%s1404_s0 + $0x30] sm:$0xff]  ;;  %v87_v32 = vld [vmem:[%s1406_s2 + $0x20] sm:$0xff] }
   0x8   :  { %103 = vperm.xlu1 %951, %v85_v25   ;;  %v171_v28 = vsel %vm151_vm0, %v61_v21, 0  ;;  %v34_v31 = vld [vmem:[%s1404_s0 + $0x38] sm:$0xff]  ;;  %v88_v33 = vld [vmem:[%s1406_s2 + $0x28] sm:$0xff]  ;;  %v51_v35 = vld [vmem:[%s1404_s0 + $0xc0] sm:$0xff] }
   0x9   :  { %v62_v34 = vpack.c.bf16 %v34_v31, %v33_v30  ;;  %v52_v36 = vld [vmem:[%s1404_s0 + $0xc8] sm:$0xff]  ;;  %v89_v37 = vld [vmem:[%s1406_s2 + $0x30] sm:$0xff]  ;;  %v90_v38 = vld [vmem:[%s1406_s2 + $0x38] sm:$0xff] }
   0xa   :  { %v71_v40 = vpack.c.bf16 %v52_v36, %v51_v35  ;;  %v35_v41 = vld [vmem:[%s1404_s0 + $0x40] sm:$0xff]  ;;  %v36_v42 = vld [vmem:[%s1404_s0 + $0x48] sm:$0xff]  ;;  %v53_v46 = vld [vmem:[%s1404_s0 + $0xd0] sm:$0xff] }
   0xb   :  { %98 = vperm.xlu0 %950, %v84_v26   ;;  %v174_v39 = vsel %vm151_vm0, %v62_v34, 0  ;;  %v317_v43 = vld [vmem:[%s1407_s4] sm:$0xff]  ;;  %v318_v44 = vld [vmem:[%s1407_s4 + $0x8] sm:$0xff]  ;;  %v63_v45 = vpack.c.bf16 %v36_v42, %v35_v41  ;;  %v54_v47 = vld [vmem:[%s1404_s0 + $0xd8] sm:$0xff] }
   0xc   :  { %108 = vperm.xlu1 %951, %v86_v27   ;;  %v319_v48 = vld [vmem:[%s1407_s4 + $0x10] sm:$0xff]  ;;  %v320_v49 = vld [vmem:[%s1407_s4 + $0x18] sm:$0xff]  ;;  %v72_v51 = vpack.c.bf16 %v54_v47, %v53_v46  ;;  %v321_v54 = vld [vmem:[%s1407_s4 + $0x20] sm:$0xff] }
   0xd   :  { %v177_v50 = vsel %vm151_vm0, %v63_v45, 0  ;;  %v37_v52 = vld [vmem:[%s1404_s0 + $0x50] sm:$0xff]  ;;  %v38_v53 = vld [vmem:[%s1404_s0 + $0x58] sm:$0xff]  ;;  %v322_v55 = vld [vmem:[%s1407_s4 + $0x28] sm:$0xff] }
   0xe   :  { %852 = vmatpush3.bf16.xpose.msra.mxu0 %v168_v16  ;;  %v64_v56 = vpack.c.bf16 %v38_v53, %v37_v52  ;;  %v55_v57 = vld [vmem:[%s1404_s0 + $0xe0] sm:$0xff]  ;;  %v56_v58 = vld [vmem:[%s1404_s0 + $0xe8] sm:$0xff]  ;;  %v323_v59 = vld [vmem:[%s1407_s4 + $0x30] sm:$0xff] }
   0xf   :  { %943 = vmatprep.subr.msk.bf16.mxu0 %vm151_vm0, %v69_v17  ;;  %113 = vperm.xlu0 %950, %v87_v32   ;;  %v324_v60 = vld [vmem:[%s1407_s4 + $0x38] sm:$0xff]  ;;  %v73_v62 = vpack.c.bf16 %v56_v58, %v55_v57  ;;  %v39_v63 = vld [vmem:[%s1404_s0 + $0x60] sm:$0xff]  ;;  %v40_v0 = vld [vmem:[%s1404_s0 + $0x68] sm:$0xff] }
  0x10   :  { %118 = vperm.xlu1 %951, %v88_v33   ;;  %v180_v61 = vsel %vm151_vm0, %v64_v56, 0  ;;  %v65_v1 = vpack.c.bf16 %v40_v0, %v39_v63  ;;  %v57_v2 = vld [vmem:[%s1404_s0 + $0xf0] sm:$0xff]  ;;  %v58_v4 = vld [vmem:[%s1404_s0 + $0xf8] sm:$0xff]  ;;  %v953_v11 = vld [vmem:[%s1405_s1 + $0x8] sm:$0xff]  }
  0x11   :  { %v74_v6 = vpack.c.bf16 %v58_v4, %v57_v2  ;;  %v41_v7 = vld [vmem:[%s1404_s0 + $0x70] sm:$0xff]  ;;  %v42_v8 = vld [vmem:[%s1404_s0 + $0x78] sm:$0xff] }
  0x12   :  { %v183_v5 = vsel %vm151_vm0, %v65_v1, 0  ;;  %v66_v9 = vpack.c.bf16 %v42_v8, %v41_v7  ;;  %v954_v12 = vld [vmem:[%s1405_s1 + $0x10] sm:$0xff]   ;;  %v955_v13 = vld [vmem:[%s1405_s1 + $0x18] sm:$0xff]  }
  0x13   :  { %123 = vperm.xlu0 %950, %v89_v37  }
  0x14   :  { %128 = vperm.xlu1 %951, %v90_v38   ;;  %v186_v10 = vsel %vm151_vm0, %v66_v9, 0 }
  0x16   :  { %854 = vmatpush3.bf16.xpose.msra.mxu0 %v171_v28 }
  0x17   :  { %944 = vmatprep.subr.msk.bf16.mxu0 %vm151_vm0, %v70_v29  ;;  %327 = vperm.xlu0 %950, %v317_v43  }
  0x18   :  { %332 = vperm.xlu1 %951, %v318_v44  }
  0x1b   :  { %337 = vperm.xlu0 %950, %v319_v48  }
  0x1c   :  { %342 = vperm.xlu1 %951, %v320_v49  }
  0x1e   :  { %856 = vmatpush3.bf16.xpose.msra.mxu0 %v174_v39 }
  0x1f   :  { %945 = vmatprep.subr.msk.bf16.mxu0 %vm151_vm0, %v71_v40  ;;  %347 = vperm.xlu0 %950, %v321_v54  }
  0x20   :  { %352 = vperm.xlu1 %951, %v322_v55  }
  0x23   :  { %357 = vperm.xlu0 %950, %v323_v59  }
  0x24   :  { %362 = vperm.xlu1 %951, %v324_v60  }
  0x26   :  { %858 = vmatpush3.bf16.xpose.msra.mxu0 %v177_v50 }
  0x27   :  { %946 = vmatprep.subr.msk.bf16.mxu0 %vm151_vm0, %v72_v51 }
  0x2e   :  { %860 = vmatpush3.bf16.xpose.msra.mxu0 %v180_v61 }
  0x2f   :  { %947 = vmatprep.subr.msk.bf16.mxu0 %vm151_vm0, %v73_v62 }
  0x36   :  { %862 = vmatpush3.bf16.xpose.msra.mxu0 %v183_v5 }
  0x37   :  { %948 = vmatprep.subr.msk.bf16.mxu0 %vm151_vm0, %v74_v6 }
  0x3e   :  { %864 = vmatpush3.bf16.xpose.msra.mxu0 %v186_v10 }
  0x45   :  { %866 = vmatmul.mubr.msk.bf16.vlgmr.msra.gmra.mrb[0].mxu0 %vm151_vm0, %v1051_v20 }
  0x46   :  { %867 = vmatprep.mubr.msk.bf16.mxu0 %vm151_vm0, %v953_v11 }
  0x4d   :  { %868 = vmatmul.mubr.msk.bf16.gmra.mrb[4].mxu0 %vm151_vm0, %v953_v11 }
  0x4e   :  { %869 = vmatprep.mubr.msk.bf16.mxu0 %vm151_vm0, %v954_v12 }
  0x55   :  { %870 = vmatmul.mubr.msk.bf16.gmra.mrb[8].mxu0 %vm151_vm0, %v954_v12 }
  0x56   :  { %871 = vmatprep.mubr.msk.bf16.mxu0 %vm151_vm0, %v955_v13 }
  0x5d   :  { %872 = vmatmul.mubr.msk.bf16.gmra.mrb[12].mxu0 %vm151_vm0, %v955_v13 }
  0x5e   :  { %430 = vmatprep.mubr.bf16.mxu0 %v964_v3 }
  0x86   :  { %v94_v14 = vpop.permute.xlu0 %93 }
  0x87   :  { %v104_v23 = vpop.permute.xlu1 %103 }
  0x8a   :  { %v99_v18 = vpop.permute.xlu0 %98 }
  0x8b   :  { %v109_v34 = vpop.permute.xlu1 %108 }
  0x8e   :  { %v114_v45 = vpop.permute.xlu0 %113 }
  0x8f   :  { %v119_v50 = vpop.permute.xlu1 %118 }
  0x92   :  { %v124_v61 = vpop.permute.xlu0 %123 }
  0x93   :  { %v129_v2 = vpop.permute.xlu1 %128 }
 0x118   :  { %v246_v15 = vpop.f32.mrb[0].mxu0 }
 0x119   :  { %v247_v16 = vadd.f32 %v246_v15, %v94_v14  ;;  %v248_v17 = vpop.f32.mrb[1].mxu0  ;;  %v956_v15 = vld [vmem:[%s1408_s3] sm:$0xff]  }
 0x11a   :  { %v249_v19 = vadd.f32 %v248_v17, %v94_v14  ;;  %v250_v20 = vpop.f32.mrb[2].mxu0  ;;  %v958_v17 = vld [vmem:[%s1408_s3 + $0x10] sm:$0xff]  }
 0x11b   :  { %v251_v21 = vadd.f32 %v250_v20, %v99_v18  ;;  %v252_v22 = vpop.f32.mrb[3].mxu0  ;;  %v285_v25 = vmax.f32 %v247_v16, 0.0  ;;  %v957_v16 = vld [vmem:[%s1408_s3 + $0x8] sm:$0xff]  }
 0x11c   :  { %v253_v24 = vadd.f32 %v252_v22, %v99_v18  ;;  %v286_v27 = vmax.f32 %v249_v19, 0.0  ;;  %v959_v18 = vld [vmem:[%s1408_s3 + $0x18] sm:$0xff]   ;;  %v960_v19 = vld [vmem:[%s1409_s5] sm:$0xff]   ;;  %v961_v20 = vld [vmem:[%s1409_s5 + $0x8] sm:$0xff]   ;;  %v328_v22 = vpop.permute.xlu0 %327 }
 0x11d   :  { %v287_v26 = vmax.f32 %v251_v21, 0.0  ;;  %v963_v21 = vld [vmem:[%s1409_s5 + $0x18] sm:$0xff]  }
 0x11e   :  { %v288_v28 = vmax.f32 %v253_v24, 0.0 }
 0x11f   :  { %v301_v29 = vpack.c.bf16 %v287_v26, %v285_v25 }
 0x120   :  { %v302_v30 = vpack.c.bf16 %v288_v28, %v286_v27  ;;  %v256_v31 = vpop.f32.mrb[4].mxu0  ;;  %v338_v24 = vpop.permute.xlu0 %337 }
 0x121   :  { %v257_v32 = vadd.f32 %v256_v31, %v104_v23  ;;  %v258_v33 = vpop.f32.mrb[5].mxu0 }
 0x122   :  { %v259_v35 = vadd.f32 %v258_v33, %v104_v23  ;;  %v260_v36 = vpop.f32.mrb[6].mxu0  ;;  %398 = vmatprep.subr.bf16.mxu0 %v302_v30  ;;  %933 = vmatprep.subr.bf16.mxu1 %v302_v30  ;;  %v333_v23 = vpop.permute.xlu1 %332 }
 0x123   :  { %v261_v37 = vadd.f32 %v260_v36, %v109_v34  ;;  %v262_v38 = vpop.f32.mrb[7].mxu0  ;;  %399 = vmatpush1.bf16.msra.mxu0 %v301_v29  ;;  %937 = vmatpush1.bf16.msra.mxu1 %v301_v29  ;;  %v289_v40 = vmax.f32 %v257_v32, 0.0 }
 0x124   :  { %v263_v39 = vadd.f32 %v262_v38, %v109_v34  ;;  %v290_v42 = vmax.f32 %v259_v35, 0.0 }
 0x125   :  { %v291_v41 = vmax.f32 %v261_v37, 0.0 }
 0x126   :  { %v292_v43 = vmax.f32 %v263_v39, 0.0  ;;  %v343_v25 = vpop.permute.xlu1 %342 }
 0x127   :  { %v303_v44 = vpack.c.bf16 %v291_v41, %v289_v40 }
 0x128   :  { %v304_v46 = vpack.c.bf16 %v292_v43, %v290_v42  ;;  %v266_v47 = vpop.f32.mrb[8].mxu0 }
 0x129   :  { %v267_v48 = vadd.f32 %v266_v47, %v114_v45  ;;  %v268_v49 = vpop.f32.mrb[9].mxu0 }
 0x12a   :  { %v269_v51 = vadd.f32 %v268_v49, %v114_v45  ;;  %v270_v52 = vpop.f32.mrb[10].mxu0  ;;  %400 = vmatprep.subr.bf16.mxu0 %v304_v46  ;;  %934 = vmatprep.subr.bf16.mxu1 %v304_v46 }
 0x12b   :  { %v271_v53 = vadd.f32 %v270_v52, %v119_v50  ;;  %v272_v54 = vpop.f32.mrb[11].mxu0  ;;  %401 = vmatpush1.bf16.msra.mxu0 %v303_v44  ;;  %938 = vmatpush1.bf16.msra.mxu1 %v303_v44  ;;  %v293_v56 = vmax.f32 %v267_v48, 0.0  ;;  %v348_v52 = vpop.permute.xlu0 %347 }
 0x12c   :  { %v273_v55 = vadd.f32 %v272_v54, %v119_v50  ;;  %v294_v58 = vmax.f32 %v269_v51, 0.0 }
 0x12d   :  { %v295_v57 = vmax.f32 %v271_v53, 0.0 }
 0x12e   :  { %v296_v59 = vmax.f32 %v273_v55, 0.0 }
 0x12f   :  { %v305_v60 = vpack.c.bf16 %v295_v57, %v293_v56 }
 0x130   :  { %v306_v62 = vpack.c.bf16 %v296_v59, %v294_v58  ;;  %v276_v63 = vpop.f32.mrb[12].mxu0  ;;  %v353_v58 = vpop.permute.xlu1 %352 }
 0x131   :  { %v277_v0 = vadd.f32 %v276_v63, %v124_v61  ;;  %v278_v1 = vpop.f32.mrb[13].mxu0 }
 0x132   :  { %v279_v4 = vadd.f32 %v278_v1, %v124_v61  ;;  %v280_v5 = vpop.f32.mrb[14].mxu0  ;;  %402 = vmatprep.subr.bf16.mxu0 %v306_v62  ;;  %935 = vmatprep.subr.bf16.mxu1 %v306_v62 }
 0x133   :  { %v281_v6 = vadd.f32 %v280_v5, %v129_v2  ;;  %v282_v7 = vpop.f32.mrb[15].mxu0  ;;  %403 = vmatpush1.bf16.msra.mxu0 %v305_v60  ;;  %939 = vmatpush1.bf16.msra.mxu1 %v305_v60  ;;  %v297_v9 = vmax.f32 %v277_v0, 0.0 }
 0x134   :  { %v283_v8 = vadd.f32 %v282_v7, %v129_v2  ;;  %v298_v11 = vmax.f32 %v279_v4, 0.0 }
 0x135   :  { %v299_v10 = vmax.f32 %v281_v6, 0.0  ;;  %v358_v6 = vpop.permute.xlu0 %357 }
 0x136   :  { %v300_v12 = vmax.f32 %v283_v8, 0.0 }
 0x137   :  { %v307_v13 = vpack.c.bf16 %v299_v10, %v297_v9 }
 0x138   :  { %v308_v14 = vpack.c.bf16 %v300_v12, %v298_v11  ;;  %v363_v11 = vpop.permute.xlu1 %362 }
 0x13a   :  { %404 = vmatprep.subr.bf16.mxu0 %v308_v14  ;;  %936 = vmatprep.subr.bf16.mxu1 %v308_v14 }
 0x13b   :  { %405 = vmatpush1.bf16.msra.mxu0 %v307_v13  ;;  %940 = vmatpush1.bf16.msra.mxu1 %v307_v13 }
 0x13c   :  { %893 = vmatprep.subr.bf16.mxu1 %v960_v19 }
 0x13e   :  { %824 = vmatmul.mubr.msk.bf16.vlgmr.msra.gmra.mrb[16].mxu0 %vm385_vm1, %v956_v15  ;;  %825 = vmatmul.mubr.msk.bf16.vlgmr.msra.gmra.mrb[0].mxu1 %vm385_vm1, %v957_v16 }
 0x13f   :  { %450 = vmatprep.mubr.bf16.mxu1 %v964_v3  ;;  %894 = vmatpush3.bf16.msra.mxu1 %v960_v19 }
 0x140   :  { %895 = vmatprep.subr.bf16.mxu1 %v961_v20 }
 0x143   :  { %896 = vmatpush3.bf16.msra.mxu1 %v961_v20 }
 0x146   :  { %826 = vmatmul.mubr.msk.bf16.gmra.mrb[4].mxu1 %vm385_vm1, %v958_v17 }
 0x147   :  { %460 = vmatprep.mubr.bf16.mxu1 %v964_v3  ;;  %v962_v3 = vld [vmem:[%s1409_s5 + $0x10] sm:$0xff]  }
 0x148   :  { %897 = vmatprep.subr.bf16.mxu1 %v962_v3 }
 0x149   :  { %898 = vmatpush3.bf16.msra.mxu1 %v962_v3 }
 0x14a   :  { %899 = vmatprep.subr.bf16.mxu1 %v963_v21 }
 0x14d   :  { %900 = vmatpush3.bf16.msra.mxu1 %v963_v21 }
 0x14e   :  { %827 = vmatmul.mubr.msk.bf16.gmra.mrb[8].mxu1 %vm385_vm1, %v959_v18 }
 0x211   :  { %v432_v26 = vpop.f32.mrb[16].mxu0  ;;  %v442_v27 = vpop.f32.mrb[0].mxu1 }
 0x212   :  { %v433_v28 = vadd.f32 %v432_v26, %v328_v22  ;;  %v443_v29 = vadd.f32 %v442_v27, %v338_v24  ;;  %v434_v30 = vpop.f32.mrb[17].mxu0  ;;  %v444_v31 = vpop.f32.mrb[1].mxu1 }
 0x213   :  { %v435_v32 = vadd.f32 %v434_v30, %v328_v22  ;;  %v445_v33 = vadd.f32 %v444_v31, %v338_v24  ;;  %v436_v34 = vpop.f32.mrb[18].mxu0  ;;  %v446_v35 = vpop.f32.mrb[2].mxu1 }
 0x214   :  { %v437_v36 = vadd.f32 %v436_v34, %v333_v23  ;;  %v447_v37 = vadd.f32 %v446_v35, %v343_v25  ;;  %v438_v38 = vpop.f32.mrb[19].mxu0  ;;  %v448_v39 = vpop.f32.mrb[3].mxu1  ;;  %v471_v42 = vmax.f32 %v433_v28, 0.0  ;;  %v475_v43 = vmax.f32 %v443_v29, 0.0 }
 0x215   :  { %v439_v40 = vadd.f32 %v438_v38, %v333_v23  ;;  %v449_v41 = vadd.f32 %v448_v39, %v343_v25  ;;  %v472_v46 = vmax.f32 %v435_v32, 0.0  ;;  %v476_v47 = vmax.f32 %v445_v33, 0.0  ;;  %v1242_v38 = vld [vmem:[%s1410_s6] ss:$0 sm:$0xff] }
 0x216   :  { %v473_v44 = vmax.f32 %v437_v36, 0.0  ;;  %v477_v45 = vmax.f32 %v447_v37, 0.0 }
 0x217   :  { %v474_v48 = vmax.f32 %v439_v40, 0.0  ;;  %v478_v49 = vmax.f32 %v449_v41, 0.0 }
 0x218   :  { %v487_v50 = vpack.c.bf16 %v473_v44, %v471_v42  ;;  %v489_v51 = vpack.c.bf16 %v477_v45, %v475_v43 }
 0x219   :  { %v488_v53 = vpack.c.bf16 %v474_v48, %v472_v46  ;;  %v490_v54 = vpack.c.bf16 %v478_v49, %v476_v47  ;;  %v452_v55 = vpop.f32.mrb[4].mxu1 }
 0x21a   :  { %v453_v56 = vadd.f32 %v452_v55, %v348_v52  ;;  %v454_v57 = vpop.f32.mrb[5].mxu1  ;;  %510 = vxpose.xlu0.c.b16.start [1/4] (short) %v487_v50, 128 }
 0x21b   :  { %v455_v59 = vadd.f32 %v454_v57, %v348_v52  ;;  %v456_v60 = vpop.f32.mrb[6].mxu1  ;;  %526 = vxpose.xlu1.c.b16.start [1/4] (short) %v488_v53, 128 }
 0x21c   :  { %v457_v61 = vadd.f32 %v456_v60, %v353_v58  ;;  %v458_v62 = vpop.f32.mrb[7].mxu1  ;;  %v479_v0 = vmax.f32 %v453_v56, 0.0 }
 0x21d   :  { %v459_v63 = vadd.f32 %v458_v62, %v353_v58  ;;  %v480_v2 = vmax.f32 %v455_v59, 0.0 }
 0x21e   :  { %v481_v1 = vmax.f32 %v457_v61, 0.0  ;;  %511 = vxpose.xlu0.c.b16.cont [2/4] (short) %v489_v51, 128 }
 0x21f   :  { %v482_v4 = vmax.f32 %v459_v63, 0.0  ;;  %527 = vxpose.xlu1.c.b16.cont [2/4] (short) %v490_v54, 128 }
 0x220   :  { %v491_v5 = vpack.c.bf16 %v481_v1, %v479_v0 }
 0x221   :  { %v492_v7 = vpack.c.bf16 %v482_v4, %v480_v2  ;;  %v462_v8 = vpop.f32.mrb[8].mxu1 }
 0x222   :  { %v463_v9 = vadd.f32 %v462_v8, %v358_v6  ;;  %v464_v10 = vpop.f32.mrb[9].mxu1  ;;  %512 = vxpose.xlu0.c.b16.cont [3/4] (short) %v491_v5, 128 }
 0x223   :  { %v465_v12 = vadd.f32 %v464_v10, %v358_v6  ;;  %v466_v13 = vpop.f32.mrb[10].mxu1  ;;  %528 = vxpose.xlu1.c.b16.cont [3/4] (short) %v492_v7, 128 }
 0x224   :  { %v467_v14 = vadd.f32 %v466_v13, %v363_v11  ;;  %v468_v15 = vpop.f32.mrb[11].mxu1  ;;  %v483_v17 = vmax.f32 %v463_v9, 0.0 }
 0x225   :  { %v469_v16 = vadd.f32 %v468_v15, %v363_v11  ;;  %v484_v19 = vmax.f32 %v465_v12, 0.0 }
 0x226   :  { %v485_v18 = vmax.f32 %v467_v14, 0.0 }
 0x227   :  { %v486_v20 = vmax.f32 %v469_v16, 0.0 }
 0x228   :  { %v493_v3 = vpack.c.bf16 %v485_v18, %v483_v17 }
 0x229   :  { %v494_v21 = vpack.c.bf16 %v486_v20, %v484_v19 }
 0x22a   :  { %513 = vxpose.xlu0.c.b16.end [4/4] (short) %v493_v3, 128 }
 0x22b   :  { %529 = vxpose.xlu1.c.b16.end [4/4] (short) %v494_v21, 128 }
 0x284   :  { %v518_v22 = vpop.trf.xlu0 }
 0x285   :  { %901 = vmatprep.mubr.msk.bf16.mxu1 %vm385_vm1, %v518_v22  ;;  %v534_v26 = vpop.trf.xlu1 }
 0x288   :  { %v519_v23 = vpop.trf.xlu0 }
 0x289   :  { %902 = vmatmul.mubr.msk.bf16.vlgmr.msra.gmra.mrb[12].mxu1 %vm385_vm1, %v519_v23  ;;  %v535_v29 = vpop.trf.xlu1 }
 0x28c   :  { %v520_v24 = vpop.trf.xlu0 }
 0x28d   :  { %905 = vmatprep.mubr.msk.bf16.mxu1 %vm385_vm1, %v520_v24  ;;  %v536_v31 = vpop.trf.xlu1 }
 0x290   :  { %v521_v25 = vpop.trf.xlu0 }
 0x291   :  { %906 = vmatmul.mubr.msk.bf16.gmra.mrb[16].mxu1 %vm385_vm1, %v521_v25  ;;  %v537_v33 = vpop.trf.xlu1 }
 0x294   :  { %v522_v27 = vpop.trf.xlu0 }
 0x295   :  { %909 = vmatprep.mubr.msk.bf16.mxu1 %vm385_vm1, %v522_v27  ;;  %v538_v34 = vpop.trf.xlu1 }
 0x298   :  { %v523_v28 = vpop.trf.xlu0 }
 0x299   :  { %910 = vmatmul.mubr.msk.bf16.gmra.mrb[20].mxu1 %vm385_vm1, %v523_v28  ;;  %v539_v35 = vpop.trf.xlu1 }
 0x29c   :  { %v524_v30 = vpop.trf.xlu0 }
 0x29d   :  { %913 = vmatprep.mubr.msk.bf16.mxu1 %vm385_vm1, %v524_v30  ;;  %v540_v36 = vpop.trf.xlu1 }
 0x2a0   :  { %v525_v32 = vpop.trf.xlu0 }
 0x2a1   :  { %914 = vmatmul.mubr.msk.bf16.gmra.mrb[24].mxu1 %vm385_vm1, %v525_v32  ;;  %v541_v37 = vpop.trf.xlu1 }
 0x2a2   :  { %917 = vmatprep.mubr.msk.bf16.mxu1 %vm385_vm1, %v534_v26 }
 0x2a9   :  { %918 = vmatmul.mubr.msk.bf16.gmra.mrb[28].mxu1 %vm385_vm1, %v535_v29 }
 0x2aa   :  { %921 = vmatprep.mubr.msk.bf16.mxu1 %vm385_vm1, %v536_v31 }
 0x2b1   :  { %922 = vmatmul.mubr.msk.bf16.gmra.mrb[32].mxu1 %vm385_vm1, %v537_v33 }
 0x2b2   :  { %925 = vmatprep.mubr.msk.bf16.mxu1 %vm385_vm1, %v538_v34 }
 0x2b9   :  { %926 = vmatmul.mubr.msk.bf16.gmra.mrb[36].mxu1 %vm385_vm1, %v539_v35 }
 0x2ba   :  { %929 = vmatprep.mubr.msk.bf16.mxu1 %vm385_vm1, %v540_v36 }
 0x2c1   :  { %930 = vmatmul.mubr.msk.bf16.gmra.mrb[40].mxu1 %vm385_vm1, %v541_v37 }
 0x35c   :  { %v903_v39 = vpop.f32.mrb[12].mxu1 }
 0x35d   :  { %v657_v40 = vadd.f32 %v903_v39, %v1242_v38  ;;  %v648_v41 = vpop.f32.mrb[13].mxu1 }
 0x35e   :  { %v649_v42 = vadd.f32 %v1242_v38, %v648_v41  ;;  %v904_v43 = vpop.f32.mrb[14].mxu1 }
 0x35f   :  { %778 = vst.msk [vmem:[%s1411_s7 + $0x10] sm:$0xff] %vm775_vm2, %v657_v40  ;;  %v660_v44 = vadd.f32 %v904_v43, %v1242_v38  ;;  %v651_v45 = vpop.f32.mrb[15].mxu1 }
 0x360   :  { %776 = vst.msk [vmem:[%s1411_s7] sm:$0xff] %vm775_vm2, %v649_v42  ;;  %v652_v46 = vadd.f32 %v1242_v38, %v651_v45 }
 0x361   :  { %779 = vst.msk [vmem:[%s1411_s7 + $0x18] sm:$0xff] %vm775_vm2, %v660_v44 }
 0x362   :  { %777 = vst.msk [vmem:[%s1411_s7 + $0x8] sm:$0xff] %vm775_vm2, %v652_v46 }
 0x364   :  { %v907_v47 = vpop.f32.mrb[16].mxu1 }
 0x365   :  { %v673_v48 = vadd.f32 %v907_v47, %v1242_v38  ;;  %v664_v49 = vpop.f32.mrb[17].mxu1 }
 0x366   :  { %v665_v50 = vadd.f32 %v1242_v38, %v664_v49  ;;  %v908_v51 = vpop.f32.mrb[18].mxu1 }
 0x367   :  { %782 = vst.msk [vmem:[%s1411_s7 + $0x30] sm:$0xff] %vm775_vm2, %v673_v48  ;;  %v676_v52 = vadd.f32 %v908_v51, %v1242_v38  ;;  %v667_v53 = vpop.f32.mrb[19].mxu1 }
 0x368   :  { %780 = vst.msk [vmem:[%s1411_s7 + $0x20] sm:$0xff] %vm775_vm2, %v665_v50  ;;  %v668_v54 = vadd.f32 %v1242_v38, %v667_v53 }
 0x369   :  { %783 = vst.msk [vmem:[%s1411_s7 + $0x38] sm:$0xff] %vm775_vm2, %v676_v52 }
 0x36a   :  { %781 = vst.msk [vmem:[%s1411_s7 + $0x28] sm:$0xff] %vm775_vm2, %v668_v54 }
 0x36c   :  { %v911_v55 = vpop.f32.mrb[20].mxu1 }
 0x36d   :  { %v689_v56 = vadd.f32 %v911_v55, %v1242_v38  ;;  %v680_v57 = vpop.f32.mrb[21].mxu1 }
 0x36e   :  { %v681_v58 = vadd.f32 %v1242_v38, %v680_v57  ;;  %v912_v59 = vpop.f32.mrb[22].mxu1 }
 0x36f   :  { %786 = vst.msk [vmem:[%s1411_s7 + $0x50] sm:$0xff] %vm775_vm2, %v689_v56  ;;  %v692_v60 = vadd.f32 %v912_v59, %v1242_v38  ;;  %v683_v61 = vpop.f32.mrb[23].mxu1 }
 0x370   :  { %784 = vst.msk [vmem:[%s1411_s7 + $0x40] sm:$0xff] %vm775_vm2, %v681_v58  ;;  %v684_v62 = vadd.f32 %v1242_v38, %v683_v61 }
 0x371   :  { %787 = vst.msk [vmem:[%s1411_s7 + $0x58] sm:$0xff] %vm775_vm2, %v692_v60 }
 0x372   :  { %785 = vst.msk [vmem:[%s1411_s7 + $0x48] sm:$0xff] %vm775_vm2, %v684_v62 }
 0x374   :  { %v915_v63 = vpop.f32.mrb[24].mxu1 }
 0x375   :  { %v705_v0 = vadd.f32 %v915_v63, %v1242_v38  ;;  %v696_v1 = vpop.f32.mrb[25].mxu1 }
 0x376   :  { %v697_v2 = vadd.f32 %v1242_v38, %v696_v1  ;;  %v916_v4 = vpop.f32.mrb[26].mxu1 }
 0x377   :  { %790 = vst.msk [vmem:[%s1411_s7 + $0x70] sm:$0xff] %vm775_vm2, %v705_v0  ;;  %v708_v5 = vadd.f32 %v916_v4, %v1242_v38  ;;  %v699_v6 = vpop.f32.mrb[27].mxu1 }
 0x378   :  { %788 = vst.msk [vmem:[%s1411_s7 + $0x60] sm:$0xff] %vm775_vm2, %v697_v2  ;;  %v700_v7 = vadd.f32 %v1242_v38, %v699_v6 }
 0x379   :  { %791 = vst.msk [vmem:[%s1411_s7 + $0x78] sm:$0xff] %vm775_vm2, %v708_v5 }
 0x37a   :  { %789 = vst.msk [vmem:[%s1411_s7 + $0x68] sm:$0xff] %vm775_vm2, %v700_v7 }
 0x37c   :  { %v919_v8 = vpop.f32.mrb[28].mxu1 }
 0x37d   :  { %v721_v9 = vadd.f32 %v919_v8, %v1242_v38  ;;  %v712_v10 = vpop.f32.mrb[29].mxu1 }
 0x37e   :  { %v713_v11 = vadd.f32 %v1242_v38, %v712_v10  ;;  %v920_v12 = vpop.f32.mrb[30].mxu1 }
 0x37f   :  { %794 = vst.msk [vmem:[%s1411_s7 + $0x90] sm:$0xff] %vm775_vm2, %v721_v9  ;;  %v724_v13 = vadd.f32 %v920_v12, %v1242_v38  ;;  %v715_v14 = vpop.f32.mrb[31].mxu1 }
 0x380   :  { %792 = vst.msk [vmem:[%s1411_s7 + $0x80] sm:$0xff] %vm775_vm2, %v713_v11  ;;  %v716_v15 = vadd.f32 %v1242_v38, %v715_v14 }
 0x381   :  { %795 = vst.msk [vmem:[%s1411_s7 + $0x98] sm:$0xff] %vm775_vm2, %v724_v13 }
 0x382   :  { %793 = vst.msk [vmem:[%s1411_s7 + $0x88] sm:$0xff] %vm775_vm2, %v716_v15 }
 0x384   :  { %v923_v16 = vpop.f32.mrb[32].mxu1 }
 0x385   :  { %v737_v17 = vadd.f32 %v923_v16, %v1242_v38  ;;  %v728_v18 = vpop.f32.mrb[33].mxu1 }
 0x386   :  { %v729_v19 = vadd.f32 %v1242_v38, %v728_v18  ;;  %v924_v20 = vpop.f32.mrb[34].mxu1 }
 0x387   :  { %798 = vst.msk [vmem:[%s1411_s7 + $0xb0] sm:$0xff] %vm775_vm2, %v737_v17  ;;  %v740_v3 = vadd.f32 %v924_v20, %v1242_v38  ;;  %v731_v21 = vpop.f32.mrb[35].mxu1 }
 0x388   :  { %796 = vst.msk [vmem:[%s1411_s7 + $0xa0] sm:$0xff] %vm775_vm2, %v729_v19  ;;  %v732_v22 = vadd.f32 %v1242_v38, %v731_v21 }
 0x389   :  { %799 = vst.msk [vmem:[%s1411_s7 + $0xb8] sm:$0xff] %vm775_vm2, %v740_v3 }
 0x38a   :  { %797 = vst.msk [vmem:[%s1411_s7 + $0xa8] sm:$0xff] %vm775_vm2, %v732_v22 }
 0x38c   :  { %v927_v23 = vpop.f32.mrb[36].mxu1 }
 0x38d   :  { %v753_v24 = vadd.f32 %v927_v23, %v1242_v38  ;;  %v744_v25 = vpop.f32.mrb[37].mxu1 }
 0x38e   :  { %v745_v26 = vadd.f32 %v1242_v38, %v744_v25  ;;  %v928_v27 = vpop.f32.mrb[38].mxu1 }
 0x38f   :  { %802 = vst.msk [vmem:[%s1411_s7 + $0xd0] sm:$0xff] %vm775_vm2, %v753_v24  ;;  %v756_v28 = vadd.f32 %v928_v27, %v1242_v38  ;;  %v747_v29 = vpop.f32.mrb[39].mxu1 }
 0x390   :  { %800 = vst.msk [vmem:[%s1411_s7 + $0xc0] sm:$0xff] %vm775_vm2, %v745_v26  ;;  %v748_v30 = vadd.f32 %v1242_v38, %v747_v29 }
 0x391   :  { %803 = vst.msk [vmem:[%s1411_s7 + $0xd8] sm:$0xff] %vm775_vm2, %v756_v28 }
 0x392   :  { %801 = vst.msk [vmem:[%s1411_s7 + $0xc8] sm:$0xff] %vm775_vm2, %v748_v30 }
 0x394   :  { %v931_v31 = vpop.f32.mrb[40].mxu1 }
 0x395   :  { %v769_v32 = vadd.f32 %v931_v31, %v1242_v38  ;;  %v760_v33 = vpop.f32.mrb[41].mxu1 }
 0x396   :  { %v761_v34 = vadd.f32 %v1242_v38, %v760_v33  ;;  %v932_v35 = vpop.f32.mrb[42].mxu1 }
 0x397   :  { %806 = vst.msk [vmem:[%s1411_s7 + $0xf0] sm:$0xff] %vm775_vm2, %v769_v32  ;;  %v772_v36 = vadd.f32 %v932_v35, %v1242_v38  ;;  %v763_v37 = vpop.f32.mrb[43].mxu1 }
 0x398   :  { %804 = vst.msk [vmem:[%s1411_s7 + $0xe0] sm:$0xff] %vm775_vm2, %v761_v34  ;;  %v764_v39 = vadd.f32 %v1242_v38, %v763_v37 }
 0x399   :  { %807 = vst.msk [vmem:[%s1411_s7 + $0xf8] sm:$0xff] %vm775_vm2, %v772_v36 }
 0x39a   :  { %805 = vst.msk [vmem:[%s1411_s7 + $0xe8] sm:$0xff] %vm775_vm2, %v764_v39 }

</bundles_post_ra>
